<compile_context>
chip_gen: v7x
topology: tpu7x:2x2x1
jax: 0.10.0
libtpu: 0.0.40
codegen_flags: <defaults>
</compile_context>

<pallas_src>
import functools

import jax
import jax.numpy as jnp
from jax.experimental import pallas as pl
from jax.experimental.pallas import tpu as pltpu

_LANE = 128


def _round_up(x, m):
    return ((x + m - 1) // m) * m


def _mlp_kernel(x_ref, w1_ref, b1_ref, w2_ref, b2_ref, w3_ref, b3_ref, out_ref):
    """Fused 3-layer MLP on one row tile; single lane-dense (mu | log_std) output."""
    x = x_ref[...]
    h1 = jnp.maximum(
        jnp.dot(x, w1_ref[...], preferred_element_type=jnp.float32) + b1_ref[...],
        0.0)
    h2 = jnp.maximum(
        jnp.dot(h1, w2_ref[...], preferred_element_type=jnp.float32) + b2_ref[...],
        0.0)
    out = jnp.dot(h2, w3_ref[...], preferred_element_type=jnp.float32) + b3_ref[...]
    out_ref[...] = out.astype(out_ref.dtype)


def prepare_params(params):
    """One-time padding of weights to lane-dense shapes (hoisted out of forward)."""
    w1, b1, w2, b2, w3, b3 = params
    H1 = w1.shape[1]
    H2 = w2.shape[1]
    O = w3.shape[1]                       # = 2 * action_size (mu | log_std layout)
    H1p = _round_up(H1, _LANE)
    H2p = _round_up(H2, _LANE)
    Op = _round_up(O, _LANE)
    w1p = jnp.pad(w1.astype(jnp.float32), ((0, 0), (0, H1p - H1)))
    b1p = jnp.pad(b1.astype(jnp.float32), ((0, 0), (0, H1p - H1)))
    w2p = jnp.pad(w2.astype(jnp.float32), ((0, H1p - H1), (0, H2p - H2)))
    b2p = jnp.pad(b2.astype(jnp.float32), ((0, 0), (0, H2p - H2)))
    w3p = jnp.pad(w3.astype(jnp.float32), ((0, H2p - H2), (0, Op - O)))
    b3p = jnp.pad(b3.astype(jnp.float32), ((0, 0), (0, Op - O)))
    return (w1p, b1p, w2p, b2p, w3p, b3p)


@functools.partial(jax.jit, static_argnames=("action_size", "tile_m", "num_cores"))
def fake_recurrent_pi_forward(obs_state, padded_params, *, action_size,
                              tile_m=1024, num_cores=1):
    """Returns (mu, log_std, fake_rnn_state) matching the PyTorch module."""
    T, B, D = obs_state.shape
    N = T * B
    A = action_size
    x = obs_state.reshape(N, D).astype(jnp.float32)

    w1p, b1p, w2p, b2p, w3p, b3p = padded_params
    H1p = w1p.shape[1]
    H2p = w2p.shape[1]
    Op = w3p.shape[1]                      # round_up(2*A, 128)

    # Row tiling: biggest tile that covers N (amortizes ~0.35 us/step), no forced
    # split on single-core chips.  For multi-core chips (v7x) round the number of
    # grid steps up to a multiple of num_cores so both TensorCores stay balanced.
    eff_tile = max(8, min(int(tile_m), _round_up(N, 8)))
    steps = pl.cdiv(N, eff_tile)
    if num_cores > 1 and steps > 1:
        steps = _round_up(steps, num_cores)
    Np = steps * eff_tile
    if Np > N:
        x = jnp.pad(x, ((0, Np - N), (0, 0)))
    grid = (steps,)

    flops = 2 * Np * (D * H1p + H1p * H2p + H2p * Op)
    bytes_accessed = 4 * (Np * D + D * H1p + H1p * H2p + H2p * Op
                          + H1p + H2p + Op + Np * Op)

    out_pad = pl.pallas_call(
        _mlp_kernel,
        out_shape=jax.ShapeDtypeStruct((Np, Op), jnp.float32),
        grid=grid,
        in_specs=[
            pl.BlockSpec((eff_tile, D), lambda i: (i, 0)),   # x row tile
            pl.BlockSpec((D, H1p), lambda i: (0, 0)),        # w1 (padded)
            pl.BlockSpec((1, H1p), lambda i: (0, 0)),        # b1
            pl.BlockSpec((H1p, H2p), lambda i: (0, 0)),      # w2
            pl.BlockSpec((1, H2p), lambda i: (0, 0)),        # b2
            pl.BlockSpec((H2p, Op), lambda i: (0, 0)),       # w3 (mu | log_std)
            pl.BlockSpec((1, Op), lambda i: (0, 0)),         # b3
        ],
        out_specs=pl.BlockSpec((eff_tile, Op), lambda i: (i, 0)),  # lane-dense out
        compiler_params=pltpu.CompilerParams(
            dimension_semantics=("parallel",)),
        cost_estimate=pl.CostEstimate(flops=int(flops), transcendentals=0,
                                      bytes_accessed=int(bytes_accessed)),
    )(x, w1p, b1p, w2p, b2p, w3p, b3p)

    # Both halves sliced from the single padded output (layout identical to
    # the unpadded last layer, so this is exact).
    mu = out_pad[:N, :A].reshape(T, B, A)
    log_std = out_pad[:N, A:2 * A].reshape(T, B, A)
    fake_rnn_state = jnp.zeros((1, B, 1), dtype=jnp.float32)
    return mu, log_std, fake_rnn_state


def init_params(key, input_size, hidden_sizes, action_size):
    """Deterministic parameter init; weights stored as (in, out)."""
    sizes = [input_size] + list(hidden_sizes) + [action_size * 2]
    params = []
    for i in range(len(sizes) - 1):
        key, kw, kb = jax.random.split(key, 3)
        fan_in = sizes[i]
        bound = 1.0 / jnp.sqrt(fan_in)
        w = jax.random.uniform(kw, (sizes[i], sizes[i + 1]),
                               minval=-bound, maxval=bound, dtype=jnp.float32)
        b = jax.random.uniform(kb, (1, sizes[i + 1]),
                               minval=-bound, maxval=bound, dtype=jnp.float32)
        params += [w, b]
    return tuple(params)


def reference_forward(obs_state, params):
    """Pure-JAX reference of the PyTorch forward, for correctness check."""
    T, B, D = obs_state.shape
    x = obs_state.reshape(T * B, D)
    w1, b1, w2, b2, w3, b3 = params
    h1 = jnp.maximum(x @ w1 + b1, 0.0)
    h2 = jnp.maximum(h1 @ w2 + b2, 0.0)
    out = h2 @ w3 + b3
    A = w3.shape[1] // 2
    mu = out[:, :A].reshape(T, B, A)
    log_std = out[:, A:].reshape(T, B, A)
    return mu, log_std, jnp.zeros((1, B, 1), dtype=jnp.float32)


if __name__ == "__main__":
    # Small shapes consistent with the module:
    # observation.state: (T, B, D) with D = prod(observation_shape.state)
    T, B, D = 8, 2, 16
    ACTION_SIZE = 4
    HIDDEN_SIZES = [32, 32]

    key = jax.random.PRNGKey(0)
    key, k_obs = jax.random.split(key)
    obs_state = jax.random.normal(k_obs, (T, B, D), dtype=jnp.float32)

    params = init_params(key, D, HIDDEN_SIZES, ACTION_SIZE)
    padded_params = jax.tree_util.tree_map(jax.device_put, prepare_params(params))

    mu, log_std, rnn_state = fake_recurrent_pi_forward(
        obs_state, padded_params, action_size=ACTION_SIZE)
    jax.block_until_ready((mu, log_std, rnn_state))

    # Correctness check against pure-JAX reference (padding is exact, f32).
    mu_ref, log_std_ref, rnn_ref = reference_forward(obs_state, params)
    assert mu.shape == (T, B, ACTION_SIZE)
    assert log_std.shape == (T, B, ACTION_SIZE)
    assert rnn_state.shape == (1, B, 1)
    assert jnp.allclose(mu, mu_ref, atol=1e-5, rtol=1e-5)
    assert jnp.allclose(log_std, log_std_ref, atol=1e-5, rtol=1e-5)
    assert jnp.allclose(rnn_state, rnn_ref)

    print("KERNEL_OK")
</pallas_src>

<mosaic_0001>
module attributes {stable_mosaic.version = 11 : i64} {
  func.func @_mlp_kernel(%arg0: i32, %arg1: memref<16x16xf32, #tpu.memory_space<vmem>>, %arg2: memref<16x128xf32, #tpu.memory_space<vmem>>, %arg3: memref<1x128xf32, #tpu.memory_space<vmem>>, %arg4: memref<128x128xf32, #tpu.memory_space<vmem>>, %arg5: memref<1x128xf32, #tpu.memory_space<vmem>>, %arg6: memref<128x128xf32, #tpu.memory_space<vmem>>, %arg7: memref<1x128xf32, #tpu.memory_space<vmem>>, %arg8: memref<16x128xf32, #tpu.memory_space<vmem>>) attributes {dimension_semantics = [#tpu.dimension_semantics<parallel>], iteration_bounds = array<i64: 1>, scalar_prefetch = 0 : i64, scratch_operands = 0 : i64, tpu.core_type = #tpu.core_type<tc>, window_params = [{transform_indices = @transform_0, window_bounds = array<i64: 16, 16>}, {pipeline_mode = #tpu.pipeline_mode<synchronous>, transform_indices = @transform_1, window_bounds = array<i64: 16, 128>}, {pipeline_mode = #tpu.pipeline_mode<synchronous>, transform_indices = @transform_2, window_bounds = array<i64: 1, 128>}, {pipeline_mode = #tpu.pipeline_mode<synchronous>, transform_indices = @transform_3, window_bounds = array<i64: 128, 128>}, {pipeline_mode = #tpu.pipeline_mode<synchronous>, transform_indices = @transform_4, window_bounds = array<i64: 1, 128>}, {pipeline_mode = #tpu.pipeline_mode<synchronous>, transform_indices = @transform_5, window_bounds = array<i64: 128, 128>}, {pipeline_mode = #tpu.pipeline_mode<synchronous>, transform_indices = @transform_6, window_bounds = array<i64: 1, 128>}, {transform_indices = @transform_7, window_bounds = array<i64: 16, 128>}]} {
    %c0 = arith.constant 0 : index
    %c0_0 = arith.constant 0 : index
    %0 = vector.load %arg1[%c0, %c0_0] : memref<16x16xf32, #tpu.memory_space<vmem>>, vector<16x16xf32>
    %c0_1 = arith.constant 0 : index
    %c0_2 = arith.constant 0 : index
    %1 = vector.load %arg2[%c0_1, %c0_2] : memref<16x128xf32, #tpu.memory_space<vmem>>, vector<16x128xf32>
    %cst = arith.constant dense<0.000000e+00> : vector<16x128xf32>
    %2 = tpu.matmul %0, %1, %cst {dimension_numbers = #tpu.dot_dimension_numbers<[1], [0], [0], [1], [0, 0, 1, 1], [], []>} : vector<16x16xf32>, vector<16x128xf32>, vector<16x128xf32> -> vector<16x128xf32>
    %c0_3 = arith.constant 0 : index
    %c0_4 = arith.constant 0 : index
    %3 = vector.load %arg3[%c0_3, %c0_4] : memref<1x128xf32, #tpu.memory_space<vmem>>, vector<1x128xf32>
    %4 = vector.broadcast %3 : vector<1x128xf32> to vector<16x128xf32>
    %5 = arith.addf %2, %4 : vector<16x128xf32>
    %cst_5 = arith.constant 0.000000e+00 : f32
    %6 = vector.broadcast %cst_5 : f32 to vector<16x128xf32>
    %7 = arith.maximumf %5, %6 : vector<16x128xf32>
    %c0_6 = arith.constant 0 : index
    %c0_7 = arith.constant 0 : index
    %8 = vector.load %arg4[%c0_6, %c0_7] : memref<128x128xf32, #tpu.memory_space<vmem>>, vector<128x128xf32>
    %cst_8 = arith.constant dense<0.000000e+00> : vector<16x128xf32>
    %9 = tpu.matmul %7, %8, %cst_8 {dimension_numbers = #tpu.dot_dimension_numbers<[1], [0], [0], [1], [0, 0, 1, 1], [], []>} : vector<16x128xf32>, vector<128x128xf32>, vector<16x128xf32> -> vector<16x128xf32>
    %c0_9 = arith.constant 0 : index
    %c0_10 = arith.constant 0 : index
    %10 = vector.load %arg5[%c0_9, %c0_10] : memref<1x128xf32, #tpu.memory_space<vmem>>, vector<1x128xf32>
    %11 = vector.broadcast %10 : vector<1x128xf32> to vector<16x128xf32>
    %12 = arith.addf %9, %11 : vector<16x128xf32>
    %cst_11 = arith.constant 0.000000e+00 : f32
    %13 = vector.broadcast %cst_11 : f32 to vector<16x128xf32>
    %14 = arith.maximumf %12, %13 : vector<16x128xf32>
    %c0_12 = arith.constant 0 : index
    %c0_13 = arith.constant 0 : index
    %15 = vector.load %arg6[%c0_12, %c0_13] : memref<128x128xf32, #tpu.memory_space<vmem>>, vector<128x128xf32>
    %cst_14 = arith.constant dense<0.000000e+00> : vector<16x128xf32>
    %16 = tpu.matmul %14, %15, %cst_14 {dimension_numbers = #tpu.dot_dimension_numbers<[1], [0], [0], [1], [0, 0, 1, 1], [], []>} : vector<16x128xf32>, vector<128x128xf32>, vector<16x128xf32> -> vector<16x128xf32>
    %c0_15 = arith.constant 0 : index
    %c0_16 = arith.constant 0 : index
    %17 = vector.load %arg7[%c0_15, %c0_16] : memref<1x128xf32, #tpu.memory_space<vmem>>, vector<1x128xf32>
    %18 = vector.broadcast %17 : vector<1x128xf32> to vector<16x128xf32>
    %19 = arith.addf %16, %18 : vector<16x128xf32>
    %c0_17 = arith.constant 0 : index
    %c0_18 = arith.constant 0 : index
    %20 = vector.load %arg8[%c0_17, %c0_18] : memref<16x128xf32, #tpu.memory_space<vmem>>, vector<16x128xf32>
    tpu.vector_store %arg8[%c0_17, %c0_18], %19 {strides = array<i32>} : memref<16x128xf32, #tpu.memory_space<vmem>>, vector<16x128xf32>,
    return
  }
  func.func @transform_0(%arg0: i32) -> (i32, i32) {
    %c0_i32 = arith.constant 0 : i32
    %c0_i32_0 = arith.constant 0 : i32
    return %arg0, %c0_i32 : i32, i32
  }
  func.func @transform_1(%arg0: i32) -> (i32, i32) {
    %c0_i32 = arith.constant 0 : i32
    %c0_i32_0 = arith.constant 0 : i32
    %c0_i32_1 = arith.constant 0 : i32
    return %c0_i32, %c0_i32_0 : i32, i32
  }
  func.func @transform_2(%arg0: i32) -> (i32, i32) {
    %c0_i32 = arith.constant 0 : i32
    %c0_i32_0 = arith.constant 0 : i32
    %c0_i32_1 = arith.constant 0 : i32
    return %c0_i32, %c0_i32_0 : i32, i32
  }
  func.func @transform_3(%arg0: i32) -> (i32, i32) {
    %c0_i32 = arith.constant 0 : i32
    %c0_i32_0 = arith.constant 0 : i32
    %c0_i32_1 = arith.constant 0 : i32
    return %c0_i32, %c0_i32_0 : i32, i32
  }
  func.func @transform_4(%arg0: i32) -> (i32, i32) {
    %c0_i32 = arith.constant 0 : i32
    %c0_i32_0 = arith.constant 0 : i32
    %c0_i32_1 = arith.constant 0 : i32
    return %c0_i32, %c0_i32_0 : i32, i32
  }
  func.func @transform_5(%arg0: i32) -> (i32, i32) {
    %c0_i32 = arith.constant 0 : i32
    %c0_i32_0 = arith.constant 0 : i32
    %c0_i32_1 = arith.constant 0 : i32
    return %c0_i32, %c0_i32_0 : i32, i32
  }
  func.func @transform_6(%arg0: i32) -> (i32, i32) {
    %c0_i32 = arith.constant 0 : i32
    %c0_i32_0 = arith.constant 0 : i32
    %c0_i32_1 = arith.constant 0 : i32
    return %c0_i32, %c0_i32_0 : i32, i32
  }
  func.func @transform_7(%arg0: i32) -> (i32, i32) {
    %c0_i32 = arith.constant 0 : i32
    %c0_i32_0 = arith.constant 0 : i32
    return %arg0, %c0_i32 : i32, i32
  }
}

</mosaic_0001>

<bundles_post_ra>
// kernel: fake_recurrent_pi_forward.1
= control target key start
LH: loop header
LB: loop body
LE: loop exit
PB: predicated region body
PF: predicated region fallthrough
CT: control target
= control target key end

     0   :  { %12 = vsyncpa [#allocation3], 0  ;;  %s753_s0 = inlined_call_operand.vmem [shape: f32[16,16], index: 0, kind: input, shape index: {}]   ;;  %s754_s1 = inlined_call_operand.hbm [shape: f32[16,128], index: 1, kind: input, shape index: {}]   ;;  %s755_s2 = inlined_call_operand.vmem [shape: f32[1,128], index: 2, kind: input, shape index: {}]   ;;  %s756_s3 = inlined_call_operand.hbm [shape: f32[128,128], index: 3, kind: input, shape index: {}]   ;;  %s757_s4 = inlined_call_operand.vmem [shape: f32[1,128], index: 4, kind: input, shape index: {}]   ;;  %s758_s5 = inlined_call_operand.hbm [shape: f32[128,128], index: 5, kind: input, shape index: {}]   ;;  %s759_s6 = inlined_call_operand.vmem [shape: f32[1,128], index: 6, kind: input, shape index: {}]   ;;  %s760_s7 = inlined_call_operand.vmem [shape: f32[16,128], index: 7, kind: output, shape index: {}]  }
   0x1   :  { %13 = vsyncpa [#allocation5], 0  ;;  %s633_s24 = smov [#allocation4]   ;;  %s634_s26 = smov [#allocation2]  }
   0x2   :  { %s35_s25 = sshll.u32 %s633_s24, 4  ;;  %s21_s27 = sshll.u32 %s634_s26, 4  ;;  %s36_s25 = int_to_ptr.vmem [resolvable:$true] %s35_s25  ;;  %s678_s27 = int_to_ptr.vmem [resolvable:$true] %s21_s27 }
   0x3   :  { %s563_s30 = scalar_lea.hbm %s756_s3, 2048 }
   0x4   :  { %p564_p0 = scmp.ne.s32.totalorder %s756_s3, %s563_s30  ;;  %p567_p1 = scmp.lt.u32.totalorder %s563_s30, %s756_s3 }
   0x6   :  { %p569_p2 = pnand %p567_p1, %p564_p0 }
   0x8   :  { %572 = shalt.err (!%p569_p2)
}
   0x9   :  { %s573_s12 = scalar_lea.vmem %s36_s25, 2048  ;;  %p578_p4 = scmp.lt.s32.totalorder %s36_s25, %s36_s25 }
   0xa   :  { %p574_p3 = scmp.ne.s32.totalorder %s36_s25, %s573_s12  ;;  %p579_p5 = scmp.lt.s32.totalorder %s573_s12, %s573_s12 }
   0xc   :  { %p580_p6 = por %p579_p5, %p578_p4 }
   0xe   :  { %p581_p7 = pnand %p580_p6, %p574_p3 }
  0x10   :  { %584 = shalt.err (!%p581_p7)
}
  0x11   :  { %s635_s13 = smov 128   ;;  %s636_s14 = smov 8  }
  0x12   :  { %41 = dma.hbm_to_vmem [thread:$0]  %s756_s3, 2048, %s36_s25, [#allocation5], %s635_s13, %s635_s13, %s636_s14  }
  0x13   :  { %s585_s19 = scalar_lea.hbm %s754_s1, 256 }
  0x14   :  { %p586_p8 = scmp.ne.s32.totalorder %s754_s1, %s585_s19  ;;  %p589_p9 = scmp.lt.u32.totalorder %s585_s19, %s754_s1 }
  0x16   :  { %p591_p10 = pnand %p589_p9, %p586_p8 }
  0x18   :  { %594 = shalt.err (!%p591_p10)
}
  0x19   :  { %s595_s24 = scalar_lea.vmem %s678_s27, 256  ;;  %p600_p12 = scmp.lt.s32.totalorder %s678_s27, %s678_s27 }
  0x1a   :  { %p596_p11 = scmp.ne.s32.totalorder %s678_s27, %s595_s24  ;;  %p601_p13 = scmp.lt.s32.totalorder %s595_s24, %s595_s24 }
  0x1c   :  { %p602_p0 = por %p601_p13, %p600_p12 }
  0x1e   :  { %p603_p1 = pnand %p602_p0, %p596_p11 }
  0x20   :  { %606 = shalt.err (!%p603_p1)
}
  0x21   :  { %27 = dma.hbm_to_vmem [thread:$0]  %s754_s1, 256, %s678_s27, [#allocation3], %s635_s13, %s635_s13, %s636_s14  }
  0x22   :  { %s637_s26 = smov [#allocation6]   ;;  %s607_s8 = scalar_lea.hbm %s758_s5, 2048 }
  0x23   :  { %s49_s28 = sshll.u32 %s637_s26, 4  ;;  %p608_p2 = scmp.ne.s32.totalorder %s758_s5, %s607_s8  ;;  %s50_s28 = int_to_ptr.vmem [resolvable:$true] %s49_s28 }
  0x24   :  { %p611_p3 = scmp.lt.u32.totalorder %s607_s8, %s758_s5 }
  0x26   :  { %p613_p4 = pnand %p611_p3, %p608_p2 }
  0x28   :  { %616 = shalt.err (!%p613_p4)
}
  0x29   :  { %s617_s15 = scalar_lea.vmem %s50_s28, 2048  ;;  %p622_p6 = scmp.lt.s32.totalorder %s50_s28, %s50_s28 }
  0x2a   :  { %p618_p5 = scmp.ne.s32.totalorder %s50_s28, %s617_s15  ;;  %p623_p7 = scmp.lt.s32.totalorder %s617_s15, %s617_s15 }
  0x2c   :  { %p624_p8 = por %p623_p7, %p622_p6 }
  0x2e   :  { %p625_p9 = pnand %p624_p8, %p618_p5 }
  0x30   :  { %628 = shalt.err (!%p625_p9)
}
  0x31   :  { %55 = dma.hbm_to_vmem [thread:$0]  %s758_s5, 2048, %s50_s28, [#allocation5], %s635_s13, %s635_s13, %s636_s14  }
  0x32   :  { %629 = dma.done.wait [#allocation3], 256  }
  0x33   :  { %630 = vsyncadd [#allocation3], 4294967040 }
  0x34   :  { %631 = dma.done.wait [#allocation5], 4096  }
  0x35   :  { %632 = vsyncadd [#allocation5], 4294963200  ;;  %vm78_vm0 = vcmask 130048   ;;  %v69_v0 = vld [vmem:[#allocation2] sm:$0xff]  ;;  %v70_v1 = vld [vmem:[#allocation2 + $0x8] sm:$0xff] }
  0x36   :  { %v67_v2 = vld [vmem:[%s753_s0] sm:$0xff]  ;;  %v490_v3 = vpack.c.bf16 %v70_v1, %v69_v0  ;;  %v162_v4 = vld [vmem:[#allocation4] sm:$0xff]  ;;  %v163_v5 = vld [vmem:[#allocation4 + $0x8] sm:$0xff] }
  0x37   :  { %417 = vmatprep.mubr.msk.f32.mxu0 %vm78_vm0, %v67_v2  ;;  %v494_v6 = vpack.c.bf16 %v163_v5, %v162_v4  ;;  %v164_v7 = vld [vmem:[#allocation4 + $0x10] sm:$0xff]  ;;  %v165_v8 = vld [vmem:[#allocation4 + $0x18] sm:$0xff]  ;;  %v166_v10 = vld [vmem:[#allocation4 + $0x20] sm:$0xff] }
  0x38   :  { %491 = vmatprep.subr.bf16.mxu0 %v490_v3  ;;  %v498_v9 = vpack.c.bf16 %v165_v8, %v164_v7  ;;  %v167_v11 = vld [vmem:[#allocation4 + $0x28] sm:$0xff]  ;;  %v68_v12 = vld [vmem:[%s753_s0 + $0x8] sm:$0xff]  ;;  %v168_v14 = vld [vmem:[#allocation4 + $0x30] sm:$0xff] }
  0x39   :  { %493 = vmatpush3.bf16.msra.mxu0 %v490_v3  ;;  %495 = vmatprep.subr.bf16.mxu1 %v494_v6  ;;  %v502_v13 = vpack.c.bf16 %v167_v11, %v166_v10  ;;  %v169_v15 = vld [vmem:[#allocation4 + $0x38] sm:$0xff]  ;;  %v170_v17 = vld [vmem:[#allocation4 + $0x40] sm:$0xff]  ;;  %v171_v18 = vld [vmem:[#allocation4 + $0x48] sm:$0xff] }
  0x3a   :  { %497 = vmatpush3.bf16.msra.mxu1 %v494_v6  ;;  %v506_v16 = vpack.c.bf16 %v169_v15, %v168_v14  ;;  %v510_v19 = vpack.c.bf16 %v171_v18, %v170_v17  ;;  %v172_v20 = vld [vmem:[#allocation4 + $0x50] sm:$0xff]  ;;  %v173_v21 = vld [vmem:[#allocation4 + $0x58] sm:$0xff]  ;;  %v174_v23 = vld [vmem:[#allocation4 + $0x60] sm:$0xff] }
  0x3b   :  { %499 = vmatprep.subr.bf16.mxu1 %v498_v9  ;;  %v514_v22 = vpack.c.bf16 %v173_v21, %v172_v20  ;;  %v175_v24 = vld [vmem:[#allocation4 + $0x68] sm:$0xff]  ;;  %v176_v26 = vld [vmem:[#allocation4 + $0x70] sm:$0xff]  ;;  %v177_v27 = vld [vmem:[#allocation4 + $0x78] sm:$0xff] }
  0x3c   :  { %418 = vmatmul.mubr.msk.f32.vlgmr.msra.gmra.mrb[0].mxu0 %vm78_vm0, %v68_v12  ;;  %v518_v25 = vpack.c.bf16 %v175_v24, %v174_v23  ;;  %v522_v28 = vpack.c.bf16 %v177_v27, %v176_v26  ;;  %v262_v29 = vld [vmem:[#allocation6] sm:$0xff]  ;;  %v263_v30 = vld [vmem:[#allocation6 + $0x8] sm:$0xff]  ;;  %v264_v31 = vld [vmem:[#allocation6 + $0x10] sm:$0xff] }
  0x3d   :  { %v526_v32 = vpack.c.bf16 %v263_v30, %v262_v29  ;;  %v265_v33 = vld [vmem:[#allocation6 + $0x18] sm:$0xff]  ;;  %v266_v35 = vld [vmem:[#allocation6 + $0x20] sm:$0xff]  ;;  %v267_v36 = vld [vmem:[#allocation6 + $0x28] sm:$0xff] }
  0x3e   :  { %501 = vmatpush3.bf16.msra.mxu1 %v498_v9  ;;  %v530_v34 = vpack.c.bf16 %v265_v33, %v264_v31  ;;  %v534_v37 = vpack.c.bf16 %v267_v36, %v266_v35  ;;  %v268_v38 = vld [vmem:[#allocation6 + $0x30] sm:$0xff]  ;;  %v269_v39 = vld [vmem:[#allocation6 + $0x38] sm:$0xff]  ;;  %v270_v41 = vld [vmem:[#allocation6 + $0x40] sm:$0xff] }
  0x3f   :  { %503 = vmatprep.subr.bf16.mxu1 %v502_v13  ;;  %527 = vmatprep.subr.bf16.mxu0 %v526_v32  ;;  %v538_v40 = vpack.c.bf16 %v269_v39, %v268_v38  ;;  %v271_v42 = vld [vmem:[#allocation6 + $0x48] sm:$0xff]  ;;  %v272_v44 = vld [vmem:[#allocation6 + $0x50] sm:$0xff]  ;;  %v273_v45 = vld [vmem:[#allocation6 + $0x58] sm:$0xff] }
  0x40   :  { %529 = vmatpush3.bf16.msra.mxu0 %v526_v32  ;;  %v542_v43 = vpack.c.bf16 %v271_v42, %v270_v41  ;;  %v546_v46 = vpack.c.bf16 %v273_v45, %v272_v44  ;;  %v274_v47 = vld [vmem:[#allocation6 + $0x60] sm:$0xff]  ;;  %v275_v48 = vld [vmem:[#allocation6 + $0x68] sm:$0xff]  ;;  %v368_v50 = vld [vmem:[%s755_s2] ss:$0 sm:$0xff] }
  0x41   :  { %531 = vmatprep.subr.bf16.mxu0 %v530_v34  ;;  %v550_v49 = vpack.c.bf16 %v275_v48, %v274_v47  ;;  %v276_v57 = vld [vmem:[#allocation6 + $0x70] sm:$0xff]  ;;  %v277_v58 = vld [vmem:[#allocation6 + $0x78] sm:$0xff] }
  0x42   :  { %505 = vmatpush3.bf16.msra.mxu1 %v502_v13  ;;  %v554_v59 = vpack.c.bf16 %v277_v58, %v276_v57  ;;  %v371_v60 = vld [vmem:[%s757_s4] ss:$0 sm:$0xff] }
  0x43   :  { %507 = vmatprep.subr.bf16.mxu1 %v506_v16  ;;  %v372_v3 = vld [vmem:[%s759_s6] ss:$0 sm:$0xff] }
  0x44   :  { %533 = vmatpush3.bf16.msra.mxu0 %v530_v34 }
  0x45   :  { %535 = vmatprep.subr.bf16.mxu0 %v534_v37 }
  0x46   :  { %509 = vmatpush3.bf16.msra.mxu1 %v506_v16 }
  0x47   :  { %511 = vmatprep.subr.bf16.mxu1 %v510_v19 }
  0x48   :  { %537 = vmatpush3.bf16.msra.mxu0 %v534_v37 }
  0x49   :  { %539 = vmatprep.subr.bf16.mxu0 %v538_v40 }
  0x4a   :  { %513 = vmatpush3.bf16.msra.mxu1 %v510_v19 }
  0x4b   :  { %515 = vmatprep.subr.bf16.mxu1 %v514_v22 }
  0x4c   :  { %541 = vmatpush3.bf16.msra.mxu0 %v538_v40 }
  0x4d   :  { %543 = vmatprep.subr.bf16.mxu0 %v542_v43 }
  0x4e   :  { %517 = vmatpush3.bf16.msra.mxu1 %v514_v22 }
  0x4f   :  { %519 = vmatprep.subr.bf16.mxu1 %v518_v25 }
  0x50   :  { %545 = vmatpush3.bf16.msra.mxu0 %v542_v43 }
  0x51   :  { %547 = vmatprep.subr.bf16.mxu0 %v546_v46 }
  0x52   :  { %521 = vmatpush3.bf16.msra.mxu1 %v518_v25 }
  0x53   :  { %523 = vmatprep.subr.bf16.mxu1 %v522_v28 }
  0x54   :  { %549 = vmatpush3.bf16.msra.mxu0 %v546_v46 }
  0x55   :  { %551 = vmatprep.subr.bf16.mxu0 %v550_v49 }
  0x56   :  { %525 = vmatpush3.bf16.msra.mxu1 %v522_v28 }
  0x58   :  { %553 = vmatpush3.bf16.msra.mxu0 %v550_v49 }
  0x59   :  { %555 = vmatprep.subr.bf16.mxu0 %v554_v59 }
  0x5c   :  { %557 = vmatpush3.bf16.msra.mxu0 %v554_v59 }
 0x10f   :  { %v419_v51 = vpop.f32.mrb[0].mxu0 }
 0x110   :  { %v157_v52 = vadd.f32 %v419_v51, %v368_v50  ;;  %v151_v53 = vpop.f32.mrb[1].mxu0 }
 0x111   :  { %v152_v54 = vadd.f32 %v368_v50, %v151_v53 }
 0x112   :  { %v161_v56 = vmax.f32 %v157_v52, 0.0 }
 0x113   :  { %v160_v55 = vmax.f32 %v152_v54, 0.0 }
 0x115   :  { %452 = vmatprep.mubr.f32.mxu1 %v160_v55 }
 0x116   :  { %453 = vmatmul.mubr.f32.vlgmr.msra.gmra.mrb[0].mxu1 %v161_v56 }
 0x1e9   :  { %v454_v61 = vpop.f32.mrb[0].mxu1 }
 0x1ea   :  { %v257_v62 = vadd.f32 %v454_v61, %v371_v60  ;;  %v251_v63 = vpop.f32.mrb[1].mxu1 }
 0x1eb   :  { %v252_v0 = vadd.f32 %v371_v60, %v251_v63 }
 0x1ec   :  { %v261_v2 = vmax.f32 %v257_v62, 0.0 }
 0x1ed   :  { %v260_v1 = vmax.f32 %v252_v0, 0.0 }
 0x1ef   :  { %487 = vmatprep.mubr.f32.mxu0 %v260_v1 }
 0x1f0   :  { %488 = vmatmul.mubr.f32.vlgmr.msra.gmra.mrb[2].mxu0 %v261_v2 }
 0x2c3   :  { %v489_v4 = vpop.f32.mrb[2].mxu0 }
 0x2c4   :  { %v357_v5 = vadd.f32 %v489_v4, %v372_v3  ;;  %v351_v6 = vpop.f32.mrb[3].mxu0 }
 0x2c5   :  { %v352_v7 = vadd.f32 %v372_v3, %v351_v6 }
 0x2c6   :  { %361 = vst [vmem:[%s760_s7 + $0x8] sm:$0xff] %v357_v5 }
 0x2c7   :  { %360 = vst [vmem:[%s760_s7] sm:$0xff] %v352_v7 }
 0x2c8   :  { %366 = vsyncpa [#allocation3], 1 }
 0x2c9   :  { %367 = vsyncpa [#allocation5], 1 }

</bundles_post_ra>
